<compile_context>
chip_gen: v5e
topology: v5e:2x2
jax: 0.10.0
libtpu: 0.0.40
codegen_flags: <defaults>
</compile_context>

<pallas_src>
import numpy as np
import jax
import jax.numpy as jnp
from jax import lax
from jax.experimental import pallas as pl
from jax.experimental.pallas import tpu as pltpu


# ---------------------------------------------------------------------------
# Compile-time constant builders (numpy) and spec helpers.
# ---------------------------------------------------------------------------

def _conv_len(lin, k, s, p):
    return (lin + 2 * p - k) // s + 1


def _tap_mask(l_phys, bt, off, hi):
    """0/1 lane mask: physical block q is valid iff 0 <= q + off < hi."""
    q = np.arange(l_phys)
    ok = ((q + off) >= 0) & ((q + off) < hi)
    return np.repeat(ok.astype(np.float32), bt)          # (l_phys * bt,)


def _valid_mask(l_phys, bt, sigma, l_logical):
    """0/1 lane mask of physical blocks that hold valid logical positions."""
    q = np.arange(l_phys)
    ok = (q % sigma == 0) & (q // sigma < l_logical)
    return np.repeat(ok.astype(np.float32), bt)[None, :]  # (1, l_phys * bt)


def _const_spec(shape):
    # Grid-invariant constant (index_map always returns block 0).  These are a
    # few KB each now; on v7x at much larger shapes add
    # pipeline_mode=pl.Buffered(1) here to single-buffer them.
    nd = len(shape)
    return pl.BlockSpec(shape, lambda i, _nd=nd: (0,) * _nd)


# ---------------------------------------------------------------------------
# Kernel.
# ---------------------------------------------------------------------------

def make_kernel(layer_cfgs, vocab_size, batch_tile, n_lanes):
    V, BT, N = vocab_size, batch_tile, n_lanes
    n_layers = len(layer_cfgs)

    def kernel(tok_ref, embT_ref, *refs):
        layer_refs = [refs[4 * i: 4 * i + 4] for i in range(n_layers)]
        vmask_ref, wpT_ref, bp_ref, out_ref, xcol_ref = refs[4 * n_layers:]

        # ---- embedding lookup as one-hot matmul (contraction = vocab) ------
        # TODO(synk): for a realistic vocabulary, replace the one-hot matmul
        # with a DMA row gather from an HBM-resident table (memory_space=pl.ANY)
        # driven by scalar-prefetched tokens.
        tok = tok_ref[0]                                           # (1, N) int32
        onehot = (lax.broadcasted_iota(jnp.int32, (V, N), 0) == tok)
        x = jnp.dot(embT_ref[...], onehot.astype(jnp.float32),
                    preferred_element_type=jnp.float32)            # (E, N) f32

        # ---- conv / ReLU / AvgPool stack ------------------------------------
        for cfg, (cmask_ref, w_ref, b_ref, pmask_ref) in zip(layer_cfgs, layer_refs):
            kc, cin, kp = cfg["kc"], cfg["cin"], cfg["kp"]
            rows = kc * cin
            # im2col via XLU rolls + edge masks, written into the VMEM scratch
            # at static sublane slices (no sublane concatenate copy).
            for j, off in enumerate(cfg["conv_off"]):
                shift = (-off * BT) % N
                tap = x if shift == 0 else pltpu.roll(x, shift, 1)
                xcol_ref[j * cin:(j + 1) * cin, :] = tap * cmask_ref[j, :]
            # one fused weight dot per layer: (Cout, K*Cin) @ (K*Cin, L*BT)
            acc = jnp.dot(w_ref[...], xcol_ref[0:rows, :],
                          preferred_element_type=jnp.float32)      # (Cout, N)
            x = jnp.maximum(acc + b_ref[...], 0.0)
            # AvgPool: kp rolls + masked adds (VPU/XLU only), exact 1/kp in f32.
            psum = None
            for m, off in enumerate(cfg["pool_off"]):
                shift = (-off * BT) % N
                tap = x if shift == 0 else pltpu.roll(x, shift, 1)
                tap = tap * pmask_ref[m, :]
                psum = tap if psum is None else psum + tap
            x = psum * (1.0 / kp)

        # ---- max over positions: zero invalid lanes + log2(L) roll tree -----
        # (post-ReLU averages are >= 0, so zeroing invalid lanes preserves max)
        xm = x * vmask_ref[0, :]
        shift = BT
        while shift < N:
            xm = jnp.maximum(xm, pltpu.roll(xm, shift, 1))
            shift *= 2
        feats = xm[:, 0:BT]                                        # (Cf, BT)

        # ---- projection, lane-dense (class dim padded to 128 lanes) ---------
        logits = lax.dot_general(feats, wpT_ref[...],
                                 dimension_numbers=(((0,), (0,)), ((), ())),
                                 preferred_element_type=jnp.float32)  # (BT, 128)
        out_ref[...] = logits + bp_ref[...]

    return kernel


# ---------------------------------------------------------------------------
# Wrapper.
# ---------------------------------------------------------------------------

def etymology_cnn_forward(tokens, params, conv_layers, batch_tile=None):
    """Forward pass.

    batch_tile=None -> whole batch in one grid step (best on single-TensorCore
    v5e/v6e: no per-step overhead).  On v7x pick batch_tile so ntiles is even
    and both TensorCores get tiles.  Prefer batch_tile*seq_len to be a multiple
    of 256 so every matmul lane dimension fills the 256-wide MXU.
    """
    B, L = tokens.shape
    embT = params["embT"]                      # (E, V) f32, padding column = 0
    E, V = embT.shape
    NC = params["wp"].shape[0]
    NCP = 128                                  # lane-dense padded class dim

    BT = B if batch_tile is None else batch_tile
    assert B % BT == 0, "batch must be divisible by batch_tile"
    ntiles = B // BT
    N = BT * L                                 # fixed lane width of every matmul

    # position-major tokens per tile: lane = position*BT + sample
    tok_pm = (tokens.reshape(ntiles, BT, L).transpose(0, 2, 1)
              .reshape(ntiles, 1, N).astype(jnp.int32))

    inputs = [tok_pm, embT.astype(jnp.float32)]
    in_specs = [pl.BlockSpec((1, 1, N), lambda i: (i, 0, 0)), _const_spec((E, V))]

    layer_cfgs = []
    sigma, l_log, cin = 1, L, E                # cumulative stride / logical len
    flops = 2 * V * E * N
    for i, (ck, cs, cp, pk, ps, pp) in enumerate(conv_layers):
        w = params[f"w{i}"]                    # (K, Cout, Cin)
        cout = w.shape[1]
        lc = _conv_len(l_log, ck, cs, cp)
        conv_off = tuple((j - cp) * sigma for j in range(ck))
        cmask = np.stack([_tap_mask(L, BT, off, l_log * sigma) for off in conv_off])
        sigma_c = sigma * cs
        lp = _conv_len(lc, pk, ps, pp)
        pool_off = tuple((m - pp) * sigma_c for m in range(pk))
        pmask = np.stack([_tap_mask(L, BT, off, lc * sigma_c) for off in pool_off])
        sigma_p = sigma_c * ps
        # no-recompaction scheme: valid positions must fit the original L blocks
        assert (lc - 1) * sigma_c < L and (lp - 1) * sigma_p < L, (
            "layer output does not fit the physical sequence length")

        wflat = jnp.transpose(w, (1, 0, 2)).reshape(cout, ck * cin)
        inputs += [jnp.asarray(cmask, jnp.float32),
                   wflat.astype(jnp.float32),
                   params[f"b{i}"].astype(jnp.float32),
                   jnp.asarray(pmask, jnp.float32)]
        in_specs += [_const_spec((ck, N)), _const_spec((cout, ck * cin)),
                     _const_spec((cout, 1)), _const_spec((pk, N))]
        layer_cfgs.append(dict(kc=ck, cin=cin, kp=pk,
                               conv_off=conv_off, pool_off=pool_off))
        flops += 2 * cout * ck * cin * N
        sigma, l_log, cin = sigma_p, lp, cout

    vmask = _valid_mask(L, BT, sigma, l_log)
    wpT = jnp.zeros((cin, NCP), jnp.float32).at[:, :NC].set(
        params["wp"].T.astype(jnp.float32))
    bpp = jnp.zeros((1, NCP), jnp.float32).at[0, :NC].set(
        params["bp"].reshape(-1).astype(jnp.float32))
    inputs += [jnp.asarray(vmask, jnp.float32), wpT, bpp]
    in_specs += [_const_spec((1, N)), _const_spec((cin, NCP)), _const_spec((1, NCP))]
    flops += 2 * cin * BT * NCP

    xcol_rows = max(cfg["kc"] * cfg["cin"] for cfg in layer_cfgs)
    bytes_accessed = int(sum(int(np.prod(a.shape)) * a.dtype.itemsize for a in inputs)
                         + B * NCP * 4)

    kernel = make_kernel(tuple(layer_cfgs), V, BT, N)
    out = pl.pallas_call(
        kernel,
        out_shape=jax.ShapeDtypeStruct((B, NCP), jnp.float32),
        grid_spec=pltpu.PrefetchScalarGridSpec(
            num_scalar_prefetch=0,
            grid=(ntiles,),
            in_specs=in_specs,
            out_specs=pl.BlockSpec((BT, NCP), lambda i: (i, 0)),
            scratch_shapes=[pltpu.VMEM((xcol_rows, N), jnp.float32)],
        ),
        compiler_params=pltpu.CompilerParams(
            dimension_semantics=("parallel",),        # v7x: tiles split across TCs
            vmem_limit_bytes=32 * 1024 * 1024),
        cost_estimate=pl.CostEstimate(flops=int(flops) * ntiles,
                                      transcendentals=0,
                                      bytes_accessed=bytes_accessed),
    )(*inputs)
    return out[:, :NC]                                # (B, num_classes)


# ---------------------------------------------------------------------------
# Params / reference.
# ---------------------------------------------------------------------------

def init_params(key, vocab_size, embedding_size, num_classes, conv_layers,
                conv_filter_count, padding_idx=0):
    keys = jax.random.split(key, 2 * len(conv_layers) + 3)
    emb = 0.1 * jax.random.normal(keys[0], (vocab_size, embedding_size), jnp.float32)
    emb = emb.at[padding_idx].set(0.0)   # torch.nn.Embedding zeroes the padding row
    params = {"embT": emb.T}
    cin = embedding_size
    for i, layer in enumerate(conv_layers):
        ck = layer[0]
        params[f"w{i}"] = 0.1 * jax.random.normal(
            keys[1 + 2 * i], (ck, conv_filter_count, cin), jnp.float32)
        params[f"b{i}"] = 0.1 * jax.random.normal(
            keys[2 + 2 * i], (conv_filter_count, 1), jnp.float32)
        cin = conv_filter_count
    params["wp"] = 0.1 * jax.random.normal(
        keys[-2], (num_classes, conv_filter_count), jnp.float32)
    params["bp"] = 0.1 * jax.random.normal(keys[-1], (num_classes, 1), jnp.float32)
    return params


def reference_forward(tokens, params, conv_layers):
    """Pure-JAX (XLA, f32) reference matching torch semantics."""
    emb = params["embT"].T                 # (V, E)
    x = emb[tokens]                        # (B, L, E)
    x = jnp.transpose(x, (0, 2, 1))        # (B, E, L)  == permute(0, 2, 1)
    for i, (ck, cs, cp, pk, ps, pp) in enumerate(conv_layers):
        w = jnp.transpose(params[f"w{i}"], (1, 2, 0))   # (Cout, Cin, K)
        bias = params[f"b{i}"][:, 0]
        x = lax.conv_general_dilated(
            x, w, window_strides=(cs,), padding=[(cp, cp)],
            dimension_numbers=("NCH", "OIH", "NCH"))
        x = jnp.maximum(x + bias[None, :, None], 0.0)
        x = lax.reduce_window(
            x, 0.0, lax.add,
            window_dimensions=(1, 1, pk),
            window_strides=(1, 1, ps),
            padding=[(0, 0), (0, 0), (pp, pp)]) / pk     # AvgPool1d (count_include_pad)
    m = jnp.max(x, axis=-1)                              # (B, Cf)
    return m @ params["wp"].T + params["bp"][:, 0][None, :]


if __name__ == "__main__":
    VOCAB = 32
    EMBED = 8
    NUM_CLASSES = 4
    CONV_FILTERS = 8
    SEQ_LEN = 16
    BATCH = 16          # default batch_tile=B -> one grid step, 256-lane matmuls
    # (conv_kernel, conv_stride, conv_pad, pool_kernel, pool_stride, pool_pad)
    CONV_LAYERS = ((3, 1, 1, 2, 2, 0), (3, 1, 1, 2, 2, 0))

    key = jax.random.PRNGKey(0)
    k_tok, k_par = jax.random.split(key)
    tokens = jax.random.randint(k_tok, (BATCH, SEQ_LEN), 0, VOCAB, dtype=jnp.int32)
    params = init_params(k_par, VOCAB, EMBED, NUM_CLASSES, CONV_LAYERS, CONV_FILTERS)

    out = etymology_cnn_forward(tokens, params, CONV_LAYERS)
    out = jax.block_until_ready(out)

    ref = reference_forward(tokens, params, CONV_LAYERS)
    np.testing.assert_allclose(np.asarray(out), np.asarray(ref), rtol=2e-2, atol=2e-2)
    print("KERNEL_OK")
</pallas_src>

<mosaic_0001>
module attributes {stable_mosaic.version = 11 : i64} {
  func.func @kernel(%arg0: i32, %arg1: memref<1x1x256xi32, #tpu.memory_space<vmem>>, %arg2: memref<8x32xf32, #tpu.memory_space<vmem>>, %arg3: memref<3x256xf32, #tpu.memory_space<vmem>>, %arg4: memref<8x24xf32, #tpu.memory_space<vmem>>, %arg5: memref<8x1xf32, #tpu.memory_space<vmem>>, %arg6: memref<2x256xf32, #tpu.memory_space<vmem>>, %arg7: memref<3x256xf32, #tpu.memory_space<vmem>>, %arg8: memref<8x24xf32, #tpu.memory_space<vmem>>, %arg9: memref<8x1xf32, #tpu.memory_space<vmem>>, %arg10: memref<2x256xf32, #tpu.memory_space<vmem>>, %arg11: memref<1x256xf32, #tpu.memory_space<vmem>>, %arg12: memref<8x128xf32, #tpu.memory_space<vmem>>, %arg13: memref<1x128xf32, #tpu.memory_space<vmem>>, %arg14: memref<16x128xf32, #tpu.memory_space<vmem>>, %arg15: memref<24x256xf32, #tpu.memory_space<vmem>>) attributes {dimension_semantics = [#tpu.dimension_semantics<parallel>], iteration_bounds = array<i64: 1>, scalar_prefetch = 0 : i64, scratch_operands = 1 : i64, tpu.core_type = #tpu.core_type<tc>, window_params = [{transform_indices = @transform_0, window_bounds = array<i64: 1, 1, 256>}, {pipeline_mode = #tpu.pipeline_mode<synchronous>, transform_indices = @transform_1, window_bounds = array<i64: 8, 32>}, {pipeline_mode = #tpu.pipeline_mode<synchronous>, transform_indices = @transform_2, window_bounds = array<i64: 3, 256>}, {pipeline_mode = #tpu.pipeline_mode<synchronous>, transform_indices = @transform_3, window_bounds = array<i64: 8, 24>}, {pipeline_mode = #tpu.pipeline_mode<synchronous>, transform_indices = @transform_4, window_bounds = array<i64: 8, 1>}, {pipeline_mode = #tpu.pipeline_mode<synchronous>, transform_indices = @transform_5, window_bounds = array<i64: 2, 256>}, {pipeline_mode = #tpu.pipeline_mode<synchronous>, transform_indices = @transform_6, window_bounds = array<i64: 3, 256>}, {pipeline_mode = #tpu.pipeline_mode<synchronous>, transform_indices = @transform_7, window_bounds = array<i64: 8, 24>}, {pipeline_mode = #tpu.pipeline_mode<synchronous>, transform_indices = @transform_8, window_bounds = array<i64: 8, 1>}, {pipeline_mode = #tpu.pipeline_mode<synchronous>, transform_indices = @transform_9, window_bounds = array<i64: 2, 256>}, {pipeline_mode = #tpu.pipeline_mode<synchronous>, transform_indices = @transform_10, window_bounds = array<i64: 1, 256>}, {pipeline_mode = #tpu.pipeline_mode<synchronous>, transform_indices = @transform_11, window_bounds = array<i64: 8, 128>}, {pipeline_mode = #tpu.pipeline_mode<synchronous>, transform_indices = @transform_12, window_bounds = array<i64: 1, 128>}, {transform_indices = @transform_13, window_bounds = array<i64: 16, 128>}]} {
    %c0 = arith.constant 0 : index
    %c0_0 = arith.constant 0 : index
    %c0_1 = arith.constant 0 : index
    %0 = vector.load %arg1[%c0, %c0_0, %c0_1] : memref<1x1x256xi32, #tpu.memory_space<vmem>>, vector<1x1x256xi32>
    %1 = vector.shape_cast %0 : vector<1x1x256xi32> to vector<1x256xi32>
    %2 = tpu.iota {dimensions = array<i32: 0>} : vector<32x256xi32>
    %3 = vector.broadcast %1 : vector<1x256xi32> to vector<32x256xi32>
    %4 = arith.cmpi eq, %2, %3 : vector<32x256xi32>
    %c0_2 = arith.constant 0 : index
    %c0_3 = arith.constant 0 : index
    %5 = vector.load %arg2[%c0_2, %c0_3] : memref<8x32xf32, #tpu.memory_space<vmem>>, vector<8x32xf32>
    %6 = arith.extui %4 : vector<32x256xi1> to vector<32x256xi32>
    %7 = arith.sitofp %6 : vector<32x256xi32> to vector<32x256xf32>
    %cst = arith.constant dense<0.000000e+00> : vector<8x256xf32>
    %8 = tpu.matmul %5, %7, %cst {dimension_numbers = #tpu.dot_dimension_numbers<[1], [0], [0], [1], [0, 0, 1, 1], [], []>} : vector<8x32xf32>, vector<32x256xf32>, vector<8x256xf32> -> vector<8x256xf32>
    %c16_i32 = arith.constant 16 : i32
    %9 = tpu.dynamic_rotate %8 by %c16_i32 dim 1 : vector<8x256xf32>, i32 -> vector<8x256xf32>
    %c0_4 = arith.constant 0 : index
    %c0_5 = arith.constant 0 : index
    %10 = vector.load %arg3[%c0_4, %c0_5] : memref<3x256xf32, #tpu.memory_space<vmem>>, vector<1x256xf32>
    %11 = vector.shape_cast %10 : vector<1x256xf32> to vector<256xf32>
    %12 = vector.shape_cast %11 : vector<256xf32> to vector<1x256xf32>
    %13 = vector.broadcast %12 : vector<1x256xf32> to vector<8x256xf32>
    %14 = arith.mulf %9, %13 : vector<8x256xf32>
    %c0_6 = arith.constant 0 : index
    %c0_7 = arith.constant 0 : index
    %15 = vector.load %arg15[%c0_6, %c0_7] : memref<24x256xf32, #tpu.memory_space<vmem>>, vector<8x256xf32>
    tpu.vector_store %arg15[%c0_6, %c0_7], %14 {strides = array<i32>} : memref<24x256xf32, #tpu.memory_space<vmem>>, vector<8x256xf32>,
    %c1 = arith.constant 1 : index
    %c0_8 = arith.constant 0 : index
    %16 = vector.load %arg3[%c1, %c0_8] : memref<3x256xf32, #tpu.memory_space<vmem>>, vector<1x256xf32>
    %17 = vector.shape_cast %16 : vector<1x256xf32> to vector<256xf32>
    %18 = vector.shape_cast %17 : vector<256xf32> to vector<1x256xf32>
    %19 = vector.broadcast %18 : vector<1x256xf32> to vector<8x256xf32>
    %20 = arith.mulf %8, %19 : vector<8x256xf32>
    %c8 = arith.constant 8 : index
    %c0_9 = arith.constant 0 : index
    %21 = vector.load %arg15[%c8, %c0_9] : memref<24x256xf32, #tpu.memory_space<vmem>>, vector<8x256xf32>
    tpu.vector_store %arg15[%c8, %c0_9], %20 {strides = array<i32>} : memref<24x256xf32, #tpu.memory_space<vmem>>, vector<8x256xf32>,
    %c240_i32 = arith.constant 240 : i32
    %22 = tpu.dynamic_rotate %8 by %c240_i32 dim 1 : vector<8x256xf32>, i32 -> vector<8x256xf32>
    %c2 = arith.constant 2 : index
    %c0_10 = arith.constant 0 : index
    %23 = vector.load %arg3[%c2, %c0_10] : memref<3x256xf32, #tpu.memory_space<vmem>>, vector<1x256xf32>
    %24 = vector.shape_cast %23 : vector<1x256xf32> to vector<256xf32>
    %25 = vector.shape_cast %24 : vector<256xf32> to vector<1x256xf32>
    %26 = vector.broadcast %25 : vector<1x256xf32> to vector<8x256xf32>
    %27 = arith.mulf %22, %26 : vector<8x256xf32>
    %c16 = arith.constant 16 : index
    %c0_11 = arith.constant 0 : index
    %28 = vector.load %arg15[%c16, %c0_11] : memref<24x256xf32, #tpu.memory_space<vmem>>, vector<8x256xf32>
    tpu.vector_store %arg15[%c16, %c0_11], %27 {strides = array<i32>} : memref<24x256xf32, #tpu.memory_space<vmem>>, vector<8x256xf32>,
    %c0_12 = arith.constant 0 : index
    %c0_13 = arith.constant 0 : index
    %29 = vector.load %arg4[%c0_12, %c0_13] : memref<8x24xf32, #tpu.memory_space<vmem>>, vector<8x24xf32>
    %c0_14 = arith.constant 0 : index
    %c0_15 = arith.constant 0 : index
    %30 = vector.load %arg15[%c0_14, %c0_15] : memref<24x256xf32, #tpu.memory_space<vmem>>, vector<24x256xf32>
    %cst_16 = arith.constant dense<0.000000e+00> : vector<8x256xf32>
    %31 = tpu.matmul %29, %30, %cst_16 {dimension_numbers = #tpu.dot_dimension_numbers<[1], [0], [0], [1], [0, 0, 1, 1], [], []>} : vector<8x24xf32>, vector<24x256xf32>, vector<8x256xf32> -> vector<8x256xf32>
    %c0_17 = arith.constant 0 : index
    %c0_18 = arith.constant 0 : index
    %32 = vector.load %arg5[%c0_17, %c0_18] : memref<8x1xf32, #tpu.memory_space<vmem>>, vector<8x1xf32>
    %33 = vector.broadcast %32 : vector<8x1xf32> to vector<8x256xf32>
    %34 = arith.addf %31, %33 : vector<8x256xf32>
    %cst_19 = arith.constant 0.000000e+00 : f32
    %35 = vector.broadcast %cst_19 : f32 to vector<8x256xf32>
    %36 = arith.maximumf %34, %35 : vector<8x256xf32>
    %c0_20 = arith.constant 0 : index
    %c0_21 = arith.constant 0 : index
    %37 = vector.load %arg6[%c0_20, %c0_21] : memref<2x256xf32, #tpu.memory_space<vmem>>, vector<1x256xf32>
    %38 = vector.shape_cast %37 : vector<1x256xf32> to vector<256xf32>
    %39 = vector.shape_cast %38 : vector<256xf32> to vector<1x256xf32>
    %40 = vector.broadcast %39 : vector<1x256xf32> to vector<8x256xf32>
    %41 = arith.mulf %36, %40 : vector<8x256xf32>
    %c240_i32_22 = arith.constant 240 : i32
    %42 = tpu.dynamic_rotate %36 by %c240_i32_22 dim 1 : vector<8x256xf32>, i32 -> vector<8x256xf32>
    %c1_23 = arith.constant 1 : index
    %c0_24 = arith.constant 0 : index
    %43 = vector.load %arg6[%c1_23, %c0_24] : memref<2x256xf32, #tpu.memory_space<vmem>>, vector<1x256xf32>
    %44 = vector.shape_cast %43 : vector<1x256xf32> to vector<256xf32>
    %45 = vector.shape_cast %44 : vector<256xf32> to vector<1x256xf32>
    %46 = vector.broadcast %45 : vector<1x256xf32> to vector<8x256xf32>
    %47 = arith.mulf %42, %46 : vector<8x256xf32>
    %48 = arith.addf %41, %47 : vector<8x256xf32>
    %cst_25 = arith.constant 5.000000e-01 : f32
    %49 = vector.broadcast %cst_25 : f32 to vector<8x256xf32>
    %50 = arith.mulf %48, %49 : vector<8x256xf32>
    %c32_i32 = arith.constant 32 : i32
    %51 = tpu.dynamic_rotate %50 by %c32_i32 dim 1 : vector<8x256xf32>, i32 -> vector<8x256xf32>
    %c0_26 = arith.constant 0 : index
    %c0_27 = arith.constant 0 : index
    %52 = vector.load %arg7[%c0_26, %c0_27] : memref<3x256xf32, #tpu.memory_space<vmem>>, vector<1x256xf32>
    %53 = vector.shape_cast %52 : vector<1x256xf32> to vector<256xf32>
    %54 = vector.shape_cast %53 : vector<256xf32> to vector<1x256xf32>
    %55 = vector.broadcast %54 : vector<1x256xf32> to vector<8x256xf32>
    %56 = arith.mulf %51, %55 : vector<8x256xf32>
    %c0_28 = arith.constant 0 : index
    %c0_29 = arith.constant 0 : index
    %57 = vector.load %arg15[%c0_28, %c0_29] : memref<24x256xf32, #tpu.memory_space<vmem>>, vector<8x256xf32>
    tpu.vector_store %arg15[%c0_28, %c0_29], %56 {strides = array<i32>} : memref<24x256xf32, #tpu.memory_space<vmem>>, vector<8x256xf32>,
    %c1_30 = arith.constant 1 : index
    %c0_31 = arith.constant 0 : index
    %58 = vector.load %arg7[%c1_30, %c0_31] : memref<3x256xf32, #tpu.memory_space<vmem>>, vector<1x256xf32>
    %59 = vector.shape_cast %58 : vector<1x256xf32> to vector<256xf32>
    %60 = vector.shape_cast %59 : vector<256xf32> to vector<1x256xf32>
    %61 = vector.broadcast %60 : vector<1x256xf32> to vector<8x256xf32>
    %62 = arith.mulf %50, %61 : vector<8x256xf32>
    %c8_32 = arith.constant 8 : index
    %c0_33 = arith.constant 0 : index
    %63 = vector.load %arg15[%c8_32, %c0_33] : memref<24x256xf32, #tpu.memory_space<vmem>>, vector<8x256xf32>
    tpu.vector_store %arg15[%c8_32, %c0_33], %62 {strides = array<i32>} : memref<24x256xf32, #tpu.memory_space<vmem>>, vector<8x256xf32>,
    %c224_i32 = arith.constant 224 : i32
    %64 = tpu.dynamic_rotate %50 by %c224_i32 dim 1 : vector<8x256xf32>, i32 -> vector<8x256xf32>
    %c2_34 = arith.constant 2 : index
    %c0_35 = arith.constant 0 : index
    %65 = vector.load %arg7[%c2_34, %c0_35] : memref<3x256xf32, #tpu.memory_space<vmem>>, vector<1x256xf32>
    %66 = vector.shape_cast %65 : vector<1x256xf32> to vector<256xf32>
    %67 = vector.shape_cast %66 : vector<256xf32> to vector<1x256xf32>
    %68 = vector.broadcast %67 : vector<1x256xf32> to vector<8x256xf32>
    %69 = arith.mulf %64, %68 : vector<8x256xf32>
    %c16_36 = arith.constant 16 : index
    %c0_37 = arith.constant 0 : index
    %70 = vector.load %arg15[%c16_36, %c0_37] : memref<24x256xf32, #tpu.memory_space<vmem>>, vector<8x256xf32>
    tpu.vector_store %arg15[%c16_36, %c0_37], %69 {strides = array<i32>} : memref<24x256xf32, #tpu.memory_space<vmem>>, vector<8x256xf32>,
    %c0_38 = arith.constant 0 : index
    %c0_39 = arith.constant 0 : index
    %71 = vector.load %arg8[%c0_38, %c0_39] : memref<8x24xf32, #tpu.memory_space<vmem>>, vector<8x24xf32>
    %c0_40 = arith.constant 0 : index
    %c0_41 = arith.constant 0 : index
    %72 = vector.load %arg15[%c0_40, %c0_41] : memref<24x256xf32, #tpu.memory_space<vmem>>, vector<24x256xf32>
    %cst_42 = arith.constant dense<0.000000e+00> : vector<8x256xf32>
    %73 = tpu.matmul %71, %72, %cst_42 {dimension_numbers = #tpu.dot_dimension_numbers<[1], [0], [0], [1], [0, 0, 1, 1], [], []>} : vector<8x24xf32>, vector<24x256xf32>, vector<8x256xf32> -> vector<8x256xf32>
    %c0_43 = arith.constant 0 : index
    %c0_44 = arith.constant 0 : index
    %74 = vector.load %arg9[%c0_43, %c0_44] : memref<8x1xf32, #tpu.memory_space<vmem>>, vector<8x1xf32>
    %75 = vector.broadcast %74 : vector<8x1xf32> to vector<8x256xf32>
    %76 = arith.addf %73, %75 : vector<8x256xf32>
    %cst_45 = arith.constant 0.000000e+00 : f32
    %77 = vector.broadcast %cst_45 : f32 to vector<8x256xf32>
    %78 = arith.maximumf %76, %77 : vector<8x256xf32>
    %c0_46 = arith.constant 0 : index
    %c0_47 = arith.constant 0 : index
    %79 = vector.load %arg10[%c0_46, %c0_47] : memref<2x256xf32, #tpu.memory_space<vmem>>, vector<1x256xf32>
    %80 = vector.shape_cast %79 : vector<1x256xf32> to vector<256xf32>
    %81 = vector.shape_cast %80 : vector<256xf32> to vector<1x256xf32>
    %82 = vector.broadcast %81 : vector<1x256xf32> to vector<8x256xf32>
    %83 = arith.mulf %78, %82 : vector<8x256xf32>
    %c224_i32_48 = arith.constant 224 : i32
    %84 = tpu.dynamic_rotate %78 by %c224_i32_48 dim 1 : vector<8x256xf32>, i32 -> vector<8x256xf32>
    %c1_49 = arith.constant 1 : index
    %c0_50 = arith.constant 0 : index
    %85 = vector.load %arg10[%c1_49, %c0_50] : memref<2x256xf32, #tpu.memory_space<vmem>>, vector<1x256xf32>
    %86 = vector.shape_cast %85 : vector<1x256xf32> to vector<256xf32>
    %87 = vector.shape_cast %86 : vector<256xf32> to vector<1x256xf32>
    %88 = vector.broadcast %87 : vector<1x256xf32> to vector<8x256xf32>
    %89 = arith.mulf %84, %88 : vector<8x256xf32>
    %90 = arith.addf %83, %89 : vector<8x256xf32>
    %cst_51 = arith.constant 5.000000e-01 : f32
    %91 = vector.broadcast %cst_51 : f32 to vector<8x256xf32>
    %92 = arith.mulf %90, %91 : vector<8x256xf32>
    %c0_52 = arith.constant 0 : index
    %c0_53 = arith.constant 0 : index
    %93 = vector.load %arg11[%c0_52, %c0_53] : memref<1x256xf32, #tpu.memory_space<vmem>>, vector<1x256xf32>
    %94 = vector.shape_cast %93 : vector<1x256xf32> to vector<256xf32>
    %95 = vector.shape_cast %94 : vector<256xf32> to vector<1x256xf32>
    %96 = vector.broadcast %95 : vector<1x256xf32> to vector<8x256xf32>
    %97 = arith.mulf %92, %96 : vector<8x256xf32>
    %c16_i32_54 = arith.constant 16 : i32
    %98 = tpu.dynamic_rotate %97 by %c16_i32_54 dim 1 : vector<8x256xf32>, i32 -> vector<8x256xf32>
    %99 = arith.maximumf %97, %98 : vector<8x256xf32>
    %c32_i32_55 = arith.constant 32 : i32
    %100 = tpu.dynamic_rotate %99 by %c32_i32_55 dim 1 : vector<8x256xf32>, i32 -> vector<8x256xf32>
    %101 = arith.maximumf %99, %100 : vector<8x256xf32>
    %c64_i32 = arith.constant 64 : i32
    %102 = tpu.dynamic_rotate %101 by %c64_i32 dim 1 : vector<8x256xf32>, i32 -> vector<8x256xf32>
    %103 = arith.maximumf %101, %102 : vector<8x256xf32>
    %c128_i32 = arith.constant 128 : i32
    %104 = tpu.dynamic_rotate %103 by %c128_i32 dim 1 : vector<8x256xf32>, i32 -> vector<8x256xf32>
    %105 = arith.maximumf %103, %104 : vector<8x256xf32>
    %106 = vector.extract_strided_slice %105 {offsets = [0, 0], sizes = [8, 16], strides = [1, 1]} : vector<8x256xf32> to vector<8x16xf32>
    %c0_56 = arith.constant 0 : index
    %c0_57 = arith.constant 0 : index
    %107 = vector.load %arg12[%c0_56, %c0_57] : memref<8x128xf32, #tpu.memory_space<vmem>>, vector<8x128xf32>
    %cst_58 = arith.constant dense<0.000000e+00> : vector<16x128xf32>
    %108 = tpu.matmul %106, %107, %cst_58 {dimension_numbers = #tpu.dot_dimension_numbers<[0], [0], [1], [1], [0, 1, 1, 1], [], []>} : vector<8x16xf32>, vector<8x128xf32>, vector<16x128xf32> -> vector<16x128xf32>
    %c0_59 = arith.constant 0 : index
    %c0_60 = arith.constant 0 : index
    %109 = vector.load %arg13[%c0_59, %c0_60] : memref<1x128xf32, #tpu.memory_space<vmem>>, vector<1x128xf32>
    %110 = vector.broadcast %109 : vector<1x128xf32> to vector<16x128xf32>
    %111 = arith.addf %108, %110 : vector<16x128xf32>
    %c0_61 = arith.constant 0 : index
    %c0_62 = arith.constant 0 : index
    %112 = vector.load %arg14[%c0_61, %c0_62] : memref<16x128xf32, #tpu.memory_space<vmem>>, vector<16x128xf32>
    tpu.vector_store %arg14[%c0_61, %c0_62], %111 {strides = array<i32>} : memref<16x128xf32, #tpu.memory_space<vmem>>, vector<16x128xf32>,
    return
  }
  func.func @transform_0(%arg0: i32) -> (i32, i32, i32) {
    %c0_i32 = arith.constant 0 : i32
    %c0_i32_0 = arith.constant 0 : i32
    %c0_i32_1 = arith.constant 0 : i32
    return %arg0, %c0_i32, %c0_i32_0 : i32, i32, i32
  }
  func.func @transform_1(%arg0: i32) -> (i32, i32) {
    %c0_i32 = arith.constant 0 : i32
    %c0_i32_0 = arith.constant 0 : i32
    %c0_i32_1 = arith.constant 0 : i32
    return %c0_i32, %c0_i32_0 : i32, i32
  }
  func.func @transform_2(%arg0: i32) -> (i32, i32) {
    %c0_i32 = arith.constant 0 : i32
    %c0_i32_0 = arith.constant 0 : i32
    %c0_i32_1 = arith.constant 0 : i32
    return %c0_i32, %c0_i32_0 : i32, i32
  }
  func.func @transform_3(%arg0: i32) -> (i32, i32) {
    %c0_i32 = arith.constant 0 : i32
    %c0_i32_0 = arith.constant 0 : i32
    %c0_i32_1 = arith.constant 0 : i32
    return %c0_i32, %c0_i32_0 : i32, i32
  }
  func.func @transform_4(%arg0: i32) -> (i32, i32) {
    %c0_i32 = arith.constant 0 : i32
    %c0_i32_0 = arith.constant 0 : i32
    %c0_i32_1 = arith.constant 0 : i32
    return %c0_i32, %c0_i32_0 : i32, i32
  }
  func.func @transform_5(%arg0: i32) -> (i32, i32) {
    %c0_i32 = arith.constant 0 : i32
    %c0_i32_0 = arith.constant 0 : i32
    %c0_i32_1 = arith.constant 0 : i32
    return %c0_i32, %c0_i32_0 : i32, i32
  }
  func.func @transform_6(%arg0: i32) -> (i32, i32) {
    %c0_i32 = arith.constant 0 : i32
    %c0_i32_0 = arith.constant 0 : i32
    %c0_i32_1 = arith.constant 0 : i32
    return %c0_i32, %c0_i32_0 : i32, i32
  }
  func.func @transform_7(%arg0: i32) -> (i32, i32) {
    %c0_i32 = arith.constant 0 : i32
    %c0_i32_0 = arith.constant 0 : i32
    %c0_i32_1 = arith.constant 0 : i32
    return %c0_i32, %c0_i32_0 : i32, i32
  }
  func.func @transform_8(%arg0: i32) -> (i32, i32) {
    %c0_i32 = arith.constant 0 : i32
    %c0_i32_0 = arith.constant 0 : i32
    %c0_i32_1 = arith.constant 0 : i32
    return %c0_i32, %c0_i32_0 : i32, i32
  }
  func.func @transform_9(%arg0: i32) -> (i32, i32) {
    %c0_i32 = arith.constant 0 : i32
    %c0_i32_0 = arith.constant 0 : i32
    %c0_i32_1 = arith.constant 0 : i32
    return %c0_i32, %c0_i32_0 : i32, i32
  }
  func.func @transform_10(%arg0: i32) -> (i32, i32) {
    %c0_i32 = arith.constant 0 : i32
    %c0_i32_0 = arith.constant 0 : i32
    %c0_i32_1 = arith.constant 0 : i32
    return %c0_i32, %c0_i32_0 : i32, i32
  }
  func.func @transform_11(%arg0: i32) -> (i32, i32) {
    %c0_i32 = arith.constant 0 : i32
    %c0_i32_0 = arith.constant 0 : i32
    %c0_i32_1 = arith.constant 0 : i32
    return %c0_i32, %c0_i32_0 : i32, i32
  }
  func.func @transform_12(%arg0: i32) -> (i32, i32) {
    %c0_i32 = arith.constant 0 : i32
    %c0_i32_0 = arith.constant 0 : i32
    %c0_i32_1 = arith.constant 0 : i32
    return %c0_i32, %c0_i32_0 : i32, i32
  }
  func.func @transform_13(%arg0: i32) -> (i32, i32) {
    %c0_i32 = arith.constant 0 : i32
    %c0_i32_0 = arith.constant 0 : i32
    return %arg0, %c0_i32 : i32, i32
  }
}

</mosaic_0001>

<bundles_post_ra>
// kernel: tpu_custom_call.1
= control target key start
LH: loop header
LB: loop body
LE: loop exit
PB: predicated region body
PF: predicated region fallthrough
CT: control target
= control target key end

     0   :  { %18 = vsyncpa [#allocation4], 0  ;;  %s1011_s0 = inlined_call_operand.hbm [shape: s32[1,1,256], index: 0, kind: input, shape index: {}]   ;;  %s1012_s1 = inlined_call_operand.vmem [shape: f32[8,32], index: 1, kind: input, shape index: {}]   ;;  %s1013_s2 = inlined_call_operand.vmem [shape: f32[3,256], index: 2, kind: input, shape index: {}]   ;;  %s1014_s3 = inlined_call_operand.hbm [shape: f32[8,24], index: 3, kind: input, shape index: {}]   ;;  %s1015_s4 = inlined_call_operand.vmem [shape: f32[8,1], index: 4, kind: input, shape index: {}]   ;;  %s1016_s5 = inlined_call_operand.hbm [shape: f32[2,256], index: 5, kind: input, shape index: {}]   ;;  %s1017_s6 = inlined_call_operand.hbm [shape: f32[3,256], index: 6, kind: input, shape index: {}]   ;;  %s1018_s7 = inlined_call_operand.vmem [shape: f32[8,24], index: 7, kind: input, shape index: {}]   ;;  %s1019_s8 = inlined_call_operand.vmem [shape: f32[8,1], index: 8, kind: input, shape index: {}]   ;;  %s1020_s9 = inlined_call_operand.hbm [shape: f32[2,256], index: 9, kind: input, shape index: {}]   ;;  %s1021_s10 = inlined_call_operand.vmem [shape: f32[1,256], index: 10, kind: input, shape index: {}]   ;;  %s1022_s11 = inlined_call_operand.hbm [shape: f32[8,128], index: 11, kind: input, shape index: {}]   ;;  %s1023_s12 = inlined_call_operand.vmem [shape: f32[1,128], index: 12, kind: input, shape index: {}]   ;;  %s1024_s13 = inlined_call_operand.hbm [shape: f32[16,128], index: 13, kind: output, shape index: {}]  }
   0x1   :  { %19 = vsyncpa [#allocation7], 0 }
   0x2   :  { %20 = vsyncpa [#allocation10], 0 }
   0x3   :  { %21 = vsyncpa [#allocation13], 0  ;;  %s43_s27 = sshll.u32 %s1014_s3, 4  ;;  %s44_s27 = int_to_ptr.hbm [resolvable:$true] %s43_s27 }
   0x4   :  { %22 = vsyncpa [#allocation5], 0  ;;  %s818_s28 = smov [#allocation6]   ;;  %s67_s15 = sshll.u32 %s1017_s6, 4  ;;  %s68_s15 = int_to_ptr.hbm [resolvable:$true] %s67_s15 }
   0x5   :  { %s45_s29 = sshll.u32 %s818_s28, 4  ;;  %s819_s16 = smov [#allocation9]   ;;  %s46_s29 = int_to_ptr.vmem [resolvable:$true] %s45_s29 }
   0x6   :  { %48 = dma.hbm_to_vmem [thread:$0]  %s44_s27, 128, %s46_s29, [#allocation7]  }
   0x7   :  { %s69_s17 = sshll.u32 %s819_s16, 4  ;;  %s28_s20 = sshll.u32 %s1011_s0, 4  ;;  %s70_s17 = int_to_ptr.vmem [resolvable:$true] %s69_s17  ;;  %s29_s20 = int_to_ptr.hbm [resolvable:$true] %s28_s20 }
   0x8   :  { %72 = dma.hbm_to_vmem [thread:$0]  %s68_s15, 128, %s70_s17, [#allocation10]  }
   0x9   :  { %s56_s22 = sshll.u32 %s1016_s5, 4  ;;  %s820_s23 = smov [#allocation3]   ;;  %s57_s22 = int_to_ptr.hbm [resolvable:$true] %s56_s22 }
   0xa   :  { %s30_s24 = sshll.u32 %s820_s23, 4  ;;  %s821_s6 = smov [#allocation8]   ;;  %s31_s24 = int_to_ptr.vmem [resolvable:$true] %s30_s24 }
   0xb   :  { %33 = dma.hbm_to_vmem [thread:$0]  %s29_s20, 32, %s31_s24, [#allocation4]  }
   0xc   :  { %s58_s25 = sshll.u32 %s821_s6, 4  ;;  %s82_s28 = sshll.u32 %s1020_s9, 4  ;;  %s59_s25 = int_to_ptr.vmem [resolvable:$true] %s58_s25  ;;  %s83_s28 = int_to_ptr.hbm [resolvable:$true] %s82_s28 }
   0xd   :  { %61 = dma.hbm_to_vmem [thread:$0]  %s57_s22, 64, %s59_s25, [#allocation7]  }
   0xe   :  { %s95_s30 = sshll.u32 %s1022_s11, 4  ;;  %s822_s14 = smov [#allocation11]   ;;  %s96_s30 = int_to_ptr.hbm [resolvable:$true] %s95_s30 }
   0xf   :  { %s84_s5 = sshll.u32 %s822_s14, 4  ;;  %s823_s15 = smov [#allocation12]   ;;  %s85_s5 = int_to_ptr.vmem [resolvable:$true] %s84_s5 }
  0x10   :  { %87 = dma.hbm_to_vmem [thread:$0]  %s83_s28, 64, %s85_s5, [#allocation10]  }
  0x11   :  { %s97_s16 = sshll.u32 %s823_s15, 4  ;;  %s98_s16 = int_to_ptr.vmem [resolvable:$true] %s97_s16 }
  0x12   :  { %100 = dma.hbm_to_vmem [thread:$0]  %s96_s30, 128, %s98_s16, [#allocation13]  }
  0x13   :  { %808 = dma.done.wait [#allocation4], 32  }
  0x14   :  { %809 = vsyncadd [#allocation4], 4294967264 }
  0x15   :  { %810 = dma.done.wait [#allocation7], 192  }
  0x16   :  { %811 = vsyncadd [#allocation7], 4294967104 }
  0x17   :  { %812 = dma.done.wait [#allocation10], 192  }
  0x18   :  { %813 = vsyncadd [#allocation10], 4294967104 }
  0x19   :  { %814 = dma.done.wait [#allocation13], 128  }
  0x1a   :  { %815 = vsyncadd [#allocation13], 4294967168  ;;  %v128_v0 = vlaneseq  ;;  %v127_v4 = vld [vmem:[#allocation3] sm:$0x3]  ;;  %v824_v7 = vmov 1.0   ;;  %vm160_vm4 = vcmask 261120  }
  0x1b   :  { %v133_v5 = vperm.slane %v127_v4, 0  ;;  %v134_v8 = vperm.slane %v127_v4, 1  ;;  %v143_v9 = vld [vmem:[%s1012_s1] sm:$0xff]  ;;  %s825_s17 = smov 16   ;;  %s826_s18 = smov 112   ;;  %v827_v13 = vmov 0  }
  0x1c   :  { %v129_v1 = vshrl.u32 %v128_v0, 7  ;;  %v259_v12 = vld [vmem:[%s1015_s4] sm:$0xff]  ;;  %637 = vset.pattern.permute.xlu2 %v827_v13  ;;  %638 = vset.pattern.permute.xlu0 %v827_v13  ;;  %v932_v16 = vand.u32 127, %v128_v0  ;;  %vm265_vm11 = vcmask 195584   ;;  %s829_s24 = smov 96   ;;  %vm540_vm15 = vcmask 64512  }
  0x1d   :  { %262 = vperm.xlu2 %637, %v259_v12   ;;  %v613_v17 = vld [vmem:[%s1013_s2 + $0x2] ss:$4 sm:$0x3]  ;;  %v612_v18 = vld [vmem:[%s1013_s2 + $0x1] ss:$4 sm:$0x3] }
  0x1e   :  { %v132_v2 = vadd.s32 24, %v129_v1  ;;  %v131_v3 = vadd.s32 16, %v129_v1  ;;  %v130_v6 = vadd.s32 8, %v129_v1  ;;  %vm135_vm3 = vcmp.eq.s32.totalorder %v129_v1, %v133_v5  ;;  %v213_v21 = vld [vmem:[%s1013_s2] ss:$4 sm:$0x3] }
  0x1f   :  { %vm136_vm8 = vcmp.eq.s32.totalorder %v129_v1, %v134_v8  ;;  %vm238_vm9 = vcmp.lt.s32.totalorder %v932_v16, 112  ;;  %v244_v19 = vperm.slane %v613_v17, 0  ;;  %v245_v20 = vperm.slane %v613_v17, 1  ;;  %v252_v38 = vld [vmem:[#allocation6] sm:$0xff]  ;;  %s828_s2 = smov 32   ;;  %s831_s29 = smov [#allocation14]  }
  0x20   :  { %vm141_vm0 = vcmp.eq.s32.totalorder %v132_v2, %v133_v5  ;;  %vm139_vm1 = vcmp.eq.s32.totalorder %v131_v3, %v133_v5  ;;  %vm137_vm2 = vcmp.eq.s32.totalorder %v130_v6, %v133_v5  ;;  %vm142_vm5 = vcmp.eq.s32.totalorder %v132_v2, %v134_v8  ;;  %v311_v46 = vld [vmem:[#allocation8] ss:$2 sm:$0x3]  ;;  %v326_v47 = vld [vmem:[#allocation8 + $0x1] ss:$2 sm:$0x3] }
  0x21   :  { %602 = vmatpush.msk.msra.mxu1 %vm141_vm0, %v824_v7  ;;  %vm140_vm6 = vcmp.eq.s32.totalorder %v131_v3, %v134_v8  ;;  %vm138_vm7 = vcmp.eq.s32.totalorder %v130_v6, %v134_v8  ;;  %vm210_vm10 = vcmp.lt.s32.totalorder %v932_v16, 16  ;;  %v226_v24 = vperm.slane %v612_v18, 0  ;;  %v391_v0 = vld [vmem:[%s1019_s8] sm:$0xff]  ;;  %v374_v1 = vld [vmem:[#allocation9 + $0x2] ss:$4 sm:$0x3] }
  0x22   :  { %v227_v25 = vperm.slane %v612_v18, 1  ;;  %v215_v30 = vperm.slane %v213_v21, 0  ;;  %v216_v31 = vperm.slane %v213_v21, 1  ;;  %v313_v48 = vperm.slane %v311_v46, 0  ;;  %s576_s30 = sshll.u32 %s831_s29, 4  ;;  %s578_s15 = sshll.u32 %s1024_s13, 4  ;;  %s577_s30 = int_to_ptr.vmem [resolvable:$true] %s576_s30  ;;  %s579_s15 = int_to_ptr.hbm [resolvable:$true] %s578_s15 }
  0x23   :  { %603 = vmatpush.msk.msra.mxu1 %vm139_vm1, %v824_v7  ;;  %v314_v49 = vperm.slane %v311_v46, 1  ;;  %v328_v50 = vperm.slane %v326_v47, 0  ;;  %v329_v51 = vperm.slane %v326_v47, 1  ;;  %v356_v2 = vld [vmem:[#allocation9 + $0x1] ss:$4 sm:$0x3] }
  0x24   :  { %vm370_vm12 = vcmp.lt.s32.totalorder %v932_v16, 96  ;;  %v376_v3 = vperm.slane %v374_v1, 0  ;;  %v377_v4 = vperm.slane %v374_v1, 1  ;;  %v359_v8 = vperm.slane %v356_v2, 1  ;;  %s832_s16 = smov 128   ;;  %s833_s9 = smov 8  }
  0x25   :  { %604 = vmatpush.msk.msra.mxu1 %vm137_vm2, %v824_v7  ;;  %v345_v13 = vld [vmem:[#allocation9] ss:$4 sm:$0x3]  ;;  %vm342_vm13 = vcmp.lt.s32.totalorder %v932_v16, 32  ;;  %vm497_vm14 = vcmp.lt.s32.totalorder %v932_v16, 64 }
  0x26   :  { %v347_v17 = vperm.slane %v345_v13, 0  ;;  %v348_v18 = vperm.slane %v345_v13, 1 }
  0x27   :  { %605 = vmatpush.msk.msra.mxu1 %vm135_vm3, %v824_v7 }
  0x28   :  { %606 = vmatmul.msk.f32.vlgmr.msra.gmra.mxu1 %vm160_vm4, %v143_v9 }
  0x29   :  { %607 = vmatpush.msk.msrb.mxu1 %vm142_vm5, %v824_v7 }
  0x2b   :  { %608 = vmatpush.msk.msrb.mxu1 %vm140_vm6, %v824_v7 }
  0x2d   :  { %609 = vmatpush.msk.msrb.mxu1 %vm138_vm7, %v824_v7 }
  0x2f   :  { %610 = vmatpush.msk.msrb.mxu1 %vm136_vm8, %v824_v7  ;;  %v358_v7 = vperm.slane %v356_v2, 0 }
  0x30   :  { %611 = vmatmul.msk.f32.vlgmr.msrb.gmra.mxu1 %vm160_vm4, %v143_v9 }
  0x77   :  { %v263_v39 = vpop.permute.xlu2 %262 }
  0xa5   :  { %v181_v10 = vpop.f32.mrf.mxu1 }
  0xa6   :  { %204 = vrot.lane.b32.xlu1 %v181_v10, %s825_s17  ;;  %234 = vrot.lane.b32.xlu0 %v181_v10, %s826_s18  ;;  %v230_v34 = vmul.f32 %v226_v24, %v181_v10 }
  0xad   :  { %v201_v11 = vpop.f32.mrf.mxu1 }
  0xae   :  { %206 = vrot.lane.b32.xlu1 %v201_v11, %s825_s17  ;;  %236 = vrot.lane.b32.xlu0 %v201_v11, %s826_s18  ;;  %v231_v35 = vmul.f32 %v227_v25, %v201_v11  ;;  %v384_v25 = vld [vmem:[%s1018_s7] sm:$0xff] }
 0x118   :  { %v205_v14 = vpop.permute.xlu1 %204  ;;  %v235_v15 = vpop.permute.xlu0 %234 }
 0x120   :  { %v207_v22 = vpop.permute.xlu1 %206  ;;  %v237_v23 = vpop.permute.xlu0 %236 }
 0x121   :  { %v239_v26 = vsel %vm238_vm9, %v235_v15, %v237_v23  ;;  %v240_v27 = vsel %vm238_vm9, %v237_v23, %v235_v15  ;;  %v211_v32 = vsel %vm210_vm10, %v205_v14, %v207_v22  ;;  %v212_v33 = vsel %vm210_vm10, %v207_v22, %v205_v14 }
 0x122   :  { %v248_v28 = vmul.f32 %v244_v19, %v239_v26  ;;  %v249_v29 = vmul.f32 %v245_v20, %v240_v27  ;;  %v219_v36 = vmul.f32 %v215_v30, %v212_v33  ;;  %v220_v37 = vmul.f32 %v216_v31, %v211_v32  ;;  %v442_v33 = vld [vmem:[#allocation11] ss:$2 sm:$0x3] }
 0x124   :  { %282 = vmatpush.msra.mxu2 %v248_v28  ;;  %302 = vmatpush.msra.mxu3 %v249_v29 }
 0x126   :  { %283 = vmatpush.msra.mxu2 %v230_v34  ;;  %303 = vmatpush.msra.mxu3 %v231_v35  ;;  %v457_v34 = vld [vmem:[#allocation11 + $0x1] ss:$2 sm:$0x3]  ;;  %v444_v35 = vperm.slane %v442_v33, 0 }
 0x128   :  { %284 = vmatpush.msra.mxu2 %v219_v36  ;;  %304 = vmatpush.msra.mxu3 %v220_v37  ;;  %v445_v36 = vperm.slane %v442_v33, 1  ;;  %v459_v37 = vperm.slane %v457_v34, 0 }
 0x129   :  { %614 = vmatmul.msk.f32.vlgmr.msra.gmra.mxu2 %vm265_vm11, %v252_v38  ;;  %615 = vmatmul.msk.f32.vlgmr.msra.gmra.mxu3 %vm265_vm11, %v252_v38  ;;  %v460_v38 = vperm.slane %v457_v34, 1 }
 0x1ac   :  { %v286_v40 = vpop.f32.mrf.mxu2  ;;  %v306_v41 = vpop.f32.mrf.mxu3 }
 0x1ad   :  { %v287_v42 = vadd.f32 %v286_v40, %v263_v39  ;;  %v307_v43 = vadd.f32 %v306_v41, %v263_v39 }
 0x1af   :  { %v309_v44 = vmax.f32 %v287_v42, 0.0  ;;  %v310_v45 = vmax.f32 %v307_v43, 0.0  ;;  %v469_v43 = vld [vmem:[%s1021_s10] sm:$0x3]  ;;  %s830_s10 = smov 64  }
 0x1b1   :  { %319 = vrot.lane.b32.xlu2 %v309_v44, %s826_s18  ;;  %321 = vrot.lane.b32.xlu0 %v310_v45, %s826_s18  ;;  %v317_v56 = vmul.f32 %v313_v48, %v309_v44  ;;  %v318_v57 = vmul.f32 %v314_v49, %v310_v45 }
 0x20b   :  { %v320_v52 = vpop.permute.xlu2 %319 }
 0x223   :  { %v322_v53 = vpop.permute.xlu0 %321 }
 0x224   :  { %v323_v54 = vsel %vm238_vm9, %v320_v52, %v322_v53  ;;  %v324_v55 = vsel %vm238_vm9, %v322_v53, %v320_v52 }
 0x225   :  { %v332_v58 = vmul.f32 %v328_v50, %v323_v54  ;;  %v333_v59 = vmul.f32 %v329_v51, %v324_v55  ;;  %v471_v50 = vperm.slane %v469_v43, 0  ;;  %v472_v51 = vperm.slane %v469_v43, 1 }
 0x227   :  { %v334_v60 = vadd.f32 %v332_v58, %v317_v56  ;;  %v335_v61 = vadd.f32 %v333_v59, %v318_v57 }
 0x229   :  { %v336_v62 = vmul.f32 0.5, %v334_v60  ;;  %v337_v63 = vmul.f32 0.5, %v335_v61 }
 0x22b   :  { %338 = vrot.lane.b32.xlu0 %v336_v62, %s828_s2  ;;  %366 = vrot.lane.b32.xlu1 %v336_v62, %s829_s24  ;;  %v362_v14 = vmul.f32 %v358_v7, %v336_v62  ;;  %v363_v15 = vmul.f32 %v359_v8, %v337_v63 }
 0x22c   :  { %368 = vrot.lane.b32.xlu2 %v337_v63, %s829_s24 }
 0x233   :  { %340 = vrot.lane.b32.xlu1 %v337_v63, %s828_s2 }
 0x234   :  { %394 = vperm.xlu2 %637, %v391_v0  }
 0x286   :  { %v369_v5 = vpop.permute.xlu2 %368 }
 0x28e   :  { %v395_v26 = vpop.permute.xlu2 %394 }
 0x29d   :  { %v367_v6 = vpop.permute.xlu1 %366  ;;  %v339_v19 = vpop.permute.xlu0 %338 }
 0x29e   :  { %v371_v9 = vsel %vm370_vm12, %v367_v6, %v369_v5  ;;  %v372_v10 = vsel %vm370_vm12, %v369_v5, %v367_v6 }
 0x29f   :  { %v380_v11 = vmul.f32 %v376_v3, %v371_v9  ;;  %v381_v12 = vmul.f32 %v377_v4, %v372_v10  ;;  %v503_v4 = vld [vmem:[#allocation12] sm:$0xff] }
 0x2a0   :  { %562 = vmatpush.msra.mxu0 %v503_v4 }
 0x2a1   :  { %413 = vmatpush.msrb.mxu2 %v380_v11  ;;  %433 = vmatpush.msrb.mxu3 %v381_v12 }
 0x2a3   :  { %414 = vmatpush.msrb.mxu2 %v362_v14  ;;  %434 = vmatpush.msrb.mxu3 %v363_v15  ;;  %v639_v14 = vld [vmem:[%s1023_s12] ss:$0 sm:$0xff] }
 0x2a5   :  { %v341_v20 = vpop.permute.xlu1 %340 }
 0x2a6   :  { %v343_v21 = vsel %vm342_vm13, %v339_v19, %v341_v20  ;;  %v344_v22 = vsel %vm342_vm13, %v341_v20, %v339_v19 }
 0x2a7   :  { %v351_v23 = vmul.f32 %v347_v17, %v344_v22  ;;  %v352_v24 = vmul.f32 %v348_v18, %v343_v21 }
 0x2a9   :  { %415 = vmatpush.msrb.mxu2 %v351_v23  ;;  %435 = vmatpush.msrb.mxu3 %v352_v24 }
 0x2aa   :  { %616 = vmatmul.msk.f32.vlgmr.msrb.gmra.mxu2 %vm265_vm11, %v384_v25  ;;  %617 = vmatmul.msk.f32.vlgmr.msrb.gmra.mxu3 %vm265_vm11, %v384_v25 }
 0x32d   :  { %v417_v27 = vpop.f32.mrf.mxu2  ;;  %v437_v28 = vpop.f32.mrf.mxu3 }
 0x32e   :  { %v418_v29 = vadd.f32 %v417_v27, %v395_v26  ;;  %v438_v30 = vadd.f32 %v437_v28, %v395_v26 }
 0x330   :  { %v440_v31 = vmax.f32 %v418_v29, 0.0  ;;  %v441_v32 = vmax.f32 %v438_v30, 0.0 }
 0x332   :  { %450 = vrot.lane.b32.xlu0 %v440_v31, %s829_s24  ;;  %452 = vrot.lane.b32.xlu1 %v441_v32, %s829_s24  ;;  %v448_v44 = vmul.f32 %v444_v35, %v440_v31  ;;  %v449_v45 = vmul.f32 %v445_v36, %v441_v32 }
 0x3a4   :  { %v451_v39 = vpop.permute.xlu0 %450  ;;  %v453_v40 = vpop.permute.xlu1 %452 }
 0x3a5   :  { %v454_v41 = vsel %vm370_vm12, %v451_v39, %v453_v40  ;;  %v455_v42 = vsel %vm370_vm12, %v453_v40, %v451_v39 }
 0x3a6   :  { %v463_v46 = vmul.f32 %v459_v37, %v454_v41  ;;  %v464_v47 = vmul.f32 %v460_v38, %v455_v42 }
 0x3a8   :  { %v465_v48 = vadd.f32 %v463_v46, %v448_v44  ;;  %v466_v49 = vadd.f32 %v464_v47, %v449_v45 }
 0x3aa   :  { %v467_v52 = vmul.f32 0.5, %v465_v48  ;;  %v468_v53 = vmul.f32 0.5, %v466_v49 }
 0x3ac   :  { %v475_v54 = vmul.f32 %v471_v50, %v467_v52  ;;  %v476_v55 = vmul.f32 %v472_v51, %v468_v53 }
 0x3ae   :  { %477 = vrot.lane.b32.xlu2 %v475_v54, %s825_s17  ;;  %479 = vrot.lane.b32.xlu0 %v476_v55, %s825_s17 }
 0x408   :  { %v478_v56 = vpop.permute.xlu2 %477 }
 0x420   :  { %v480_v57 = vpop.permute.xlu0 %479 }
 0x421   :  { %v481_v58 = vsel %vm210_vm10, %v478_v56, %v480_v57  ;;  %v482_v59 = vsel %vm210_vm10, %v480_v57, %v478_v56 }
 0x422   :  { %v483_v60 = vmax.f32 %v475_v54, %v482_v59  ;;  %v484_v61 = vmax.f32 %v476_v55, %v481_v58 }
 0x424   :  { %485 = vrot.lane.b32.xlu1 %v483_v60, %s828_s2  ;;  %487 = vrot.lane.b32.xlu2 %v484_v61, %s828_s2 }
 0x47e   :  { %v488_v62 = vpop.permute.xlu2 %487 }
 0x496   :  { %v486_v63 = vpop.permute.xlu1 %485 }
 0x497   :  { %v489_v0 = vsel %vm342_vm13, %v486_v63, %v488_v62  ;;  %v490_v1 = vsel %vm342_vm13, %v488_v62, %v486_v63 }
 0x498   :  { %v491_v2 = vmax.f32 %v483_v60, %v490_v1  ;;  %v492_v3 = vmax.f32 %v484_v61, %v489_v0 }
 0x49a   :  { %493 = vrot.lane.b32.xlu0 %v491_v2, %s830_s10  ;;  %495 = vrot.lane.b32.xlu1 %v492_v3, %s830_s10 }
 0x50c   :  { %v494_v5 = vpop.permute.xlu0 %493  ;;  %v496_v6 = vpop.permute.xlu1 %495 }
 0x50d   :  { %v498_v7 = vsel %vm497_vm14, %v494_v5, %v496_v6  ;;  %v499_v8 = vsel %vm497_vm14, %v496_v6, %v494_v5 }
 0x50e   :  { %v500_v9 = vmax.f32 %v491_v2, %v499_v8  ;;  %v501_v10 = vmax.f32 %v492_v3, %v498_v7 }
 0x510   :  { %v502_v11 = vmax.f32 %v500_v9, %v501_v10 }
 0x512   :  { %508 = vxpose.xlu2.b32.start.end [1/1] (short) (narrow) %v502_v11, 16 }
 0x5ab   :  { %v524_v12 = vpop.trf.xlu2 }
 0x5ac   :  { %618 = vmatmul.msk.f32.vlgmr.msra.gmra.mxu0 %vm540_vm15, %v524_v12 }
 0x5b3   :  { %v525_v13 = vpop.trf.xlu2 }
 0x5b4   :  { %619 = vmatmul.msk.f32.gmra.mxu0 %vm540_vm15, %v525_v13 }
 0x629   :  { %v564_v15 = vpop.f32.mrf.mxu0 }
 0x62a   :  { %v565_v17 = vadd.f32 %v639_v14, %v564_v15 }
 0x62c   :  { %570 = vst [vmem:[#allocation14] sm:$0xff] %v565_v17 }
 0x631   :  { %v567_v16 = vpop.f32.mrf.mxu0 }
 0x632   :  { %v568_v18 = vadd.f32 %v639_v14, %v567_v16 }
 0x634   :  { %571 = vst [vmem:[#allocation14 + $0x8] sm:$0xff] %v568_v18 }
 0x635   :  { %584 = dma.vmem_to_hbm [thread:$0]  %s577_s30, 256, %s579_s15, [#allocation5], %s832_s16, %s832_s16, %s833_s9  }
 0x636   :  { %816 = dma.done.wait [#allocation5], 256  }
 0x637   :  { %817 = vsyncadd [#allocation5], 4294967040 }
 0x638   :  { %589 = vsyncpa [#allocation4], 1 }
 0x639   :  { %590 = vsyncpa [#allocation7], 1 }
 0x63a   :  { %591 = vsyncpa [#allocation10], 1 }
 0x63b   :  { %592 = vsyncpa [#allocation13], 1 }
 0x63c   :  { %593 = vsyncpa [#allocation5], 1 }

</bundles_post_ra>
